<compile_context>
chip_gen: v5e
topology: v5e:2x2
jax: 0.10.0
libtpu: 0.0.40
codegen_flags: <defaults>
</compile_context>

<pallas_src>
import jax
import jax.numpy as jnp
from jax.experimental import pallas as pl
from jax.experimental.pallas import tpu as pltpu


# ---------------------------------------------------------------------------
# Pallas kernel: fused 3-layer MLP (bf16 MXU matmuls, f32 accumulation / VPU)
# ---------------------------------------------------------------------------
def mlp_kernel(x_ref, w1_ref, b1_ref, w2_ref, b2_ref, w3_ref, b3_ref, o_ref):
    x = x_ref[...]  # (tile_b, 128) bf16 (K padded 64 -> 128 with zeros)

    # Layer 0: FCL(64 -> 128) + ReLU    (Dropout p=0.1 is identity at eval)
    h = jnp.dot(x, w1_ref[...], preferred_element_type=jnp.float32) + b1_ref[...]
    h = jnp.maximum(h, 0.0)

    # Layer 1: FCL(128 -> 128) + ReLU
    h = jnp.dot(h.astype(jnp.bfloat16), w2_ref[...],
                preferred_element_type=jnp.float32) + b2_ref[...]
    h = jnp.maximum(h, 0.0)

    # Layer 2: FCL(128 -> 32), output padded to 128 lanes (cols 32..127 are 0)
    o_ref[...] = (
        jnp.dot(h.astype(jnp.bfloat16), w3_ref[...],
                preferred_element_type=jnp.float32) + b3_ref[...]
    ).astype(o_ref.dtype)


def _round_up(x, m):
    return ((x + m - 1) // m) * m


def mlp_forward(x, params, *, tile_b=256):
    """Fused MLP forward.  Handles any batch size via zero-padding."""
    (w1, b1), (w2, b2), (w3, b3) = params  # transposed: (in, out)
    B, D_in = x.shape
    D_h1 = w1.shape[1]          # 128
    D_h2 = w2.shape[1]          # 128
    D_out = w3.shape[1]         # 32
    LANE = 128

    # ---- tile selection: big tiles, rebalanced so remainders are small and
    #      (on v7x) there are >=2 parallel grid steps when the batch allows it.
    n_tiles = pl.cdiv(B, tile_b)
    tile_b = _round_up(pl.cdiv(B, n_tiles), 8)
    B_pad = n_tiles * tile_b

    # ---- lane-dense padding + bf16 operand prep (f32 accumulation in-kernel)
    D_in_pad = _round_up(D_in, LANE)      # 64  -> 128
    D_out_pad = _round_up(D_out, LANE)    # 32  -> 128

    x_p = jnp.zeros((B_pad, D_in_pad), jnp.bfloat16)
    x_p = x_p.at[:B, :D_in].set(x.astype(jnp.bfloat16))

    w1_p = jnp.zeros((D_in_pad, D_h1), jnp.bfloat16).at[:D_in, :].set(
        w1.astype(jnp.bfloat16))
    w2_p = w2.astype(jnp.bfloat16)
    w3_p = jnp.zeros((D_h2, D_out_pad), jnp.bfloat16).at[:, :D_out].set(
        w3.astype(jnp.bfloat16))

    b1_2d = b1.reshape(1, D_h1).astype(jnp.float32)
    b2_2d = b2.reshape(1, D_h2).astype(jnp.float32)
    b3_2d = jnp.zeros((1, D_out_pad), jnp.float32).at[0, :D_out].set(
        b3.astype(jnp.float32))

    grid = (n_tiles,)
    full = lambda shape: pl.BlockSpec(shape, lambda i: (0, 0))

    flops = 2 * B_pad * (D_in_pad * D_h1 + D_h1 * D_h2 + D_h2 * D_out_pad)
    bytes_accessed = (
        B_pad * D_in_pad * 2                      # x (bf16)
        + (D_in_pad * D_h1 + D_h1 * D_h2 + D_h2 * D_out_pad) * 2  # weights
        + (D_h1 + D_h2 + D_out_pad) * 4           # biases (f32)
        + B_pad * D_out_pad * 4                   # output (f32)
    )

    out_padded = pl.pallas_call(
        mlp_kernel,
        out_shape=jax.ShapeDtypeStruct((B_pad, D_out_pad), jnp.float32),
        grid_spec=pltpu.PrefetchScalarGridSpec(
            num_scalar_prefetch=0,
            grid=grid,
            in_specs=[
                pl.BlockSpec((tile_b, D_in_pad), lambda i: (i, 0)),  # x tile
                full((D_in_pad, D_h1)),    # W1^T (padded K)
                full((1, D_h1)),           # b1
                full((D_h1, D_h2)),        # W2^T
                full((1, D_h2)),           # b2
                full((D_h2, D_out_pad)),   # W3^T (padded N)
                full((1, D_out_pad)),      # b3 (padded)
            ],
            out_specs=pl.BlockSpec((tile_b, D_out_pad), lambda i: (i, 0)),
        ),
        compiler_params=pltpu.CompilerParams(
            dimension_semantics=("parallel",),
        ),
        cost_estimate=pl.CostEstimate(
            flops=flops, transcendentals=0, bytes_accessed=bytes_accessed),
    )(x_p, w1_p, b1_2d, w2_p, b2_2d, w3_p, b3_2d)

    # Strip batch + lane padding in the wrapper.
    return out_padded[:B, :D_out]


# ---------------------------------------------------------------------------
# Deterministic parameter construction (PyTorch Linear shapes, then transposed)
# ---------------------------------------------------------------------------
def init_params(key):
    # FCL(64,128) -> ReLU -> Dropout(0.1) -> FCL(128,128) -> ReLU -> FCL(128,32)
    dims = [(64, 128), (128, 128), (128, 32)]
    params = []
    for (d_in, d_out) in dims:
        key, kw, kb = jax.random.split(key, 3)
        bound = 1.0 / jnp.sqrt(d_in)
        # PyTorch nn.Linear stores weight as (out, in); init U(-1/sqrt(in), 1/sqrt(in)).
        w_torch = jax.random.uniform(kw, (d_out, d_in), jnp.float32, -bound, bound)
        b = jax.random.uniform(kb, (d_out,), jnp.float32, -bound, bound)
        params.append((w_torch.T, b))   # pre-transpose: y = x @ W^T + b
    return params
    # TODO(synk): Batchnorm1d and train-mode Dropout branches of the module are
    # not present in this architecture instance; a running-stats affine (or a
    # pltpu.prng_random_bits dropout mask) would fuse the same way.


def reference_forward(x, params):
    (w1, b1), (w2, b2), (w3, b3) = params
    h = jnp.maximum(x @ w1 + b1, 0.0)
    h = jnp.maximum(h @ w2 + b2, 0.0)   # dropout identity (eval)
    return h @ w3 + b3


if __name__ == "__main__":
    key = jax.random.PRNGKey(0)
    key, kx = jax.random.split(key)

    batch, d_in = 300, 64   # non-multiple-of-tile batch exercises padding path
    x = jax.random.normal(kx, (batch, d_in), jnp.float32)
    params = init_params(key)

    out = mlp_forward(x, params)
    out = jax.block_until_ready(out)

    ref = reference_forward(x, params)
    assert out.shape == (batch, 32)
    # bf16 matmul operands (f32 accumulation) vs pure-f32 reference.
    assert jnp.allclose(out, ref, atol=5e-2, rtol=5e-2)

    print("KERNEL_OK")
</pallas_src>

<mosaic_0001>
module attributes {stable_mosaic.version = 11 : i64} {
  func.func @mlp_kernel(%arg0: i32, %arg1: memref<152x128xbf16, #tpu.memory_space<vmem>>, %arg2: memref<128x128xbf16, #tpu.memory_space<vmem>>, %arg3: memref<1x128xf32, #tpu.memory_space<vmem>>, %arg4: memref<128x128xbf16, #tpu.memory_space<vmem>>, %arg5: memref<1x128xf32, #tpu.memory_space<vmem>>, %arg6: memref<128x128xbf16, #tpu.memory_space<vmem>>, %arg7: memref<1x128xf32, #tpu.memory_space<vmem>>, %arg8: memref<152x128xf32, #tpu.memory_space<vmem>>) attributes {dimension_semantics = [#tpu.dimension_semantics<parallel>], iteration_bounds = array<i64: 2>, scalar_prefetch = 0 : i64, scratch_operands = 0 : i64, tpu.core_type = #tpu.core_type<tc>, window_params = [{transform_indices = @transform_0, window_bounds = array<i64: 152, 128>}, {pipeline_mode = #tpu.pipeline_mode<synchronous>, transform_indices = @transform_1, window_bounds = array<i64: 128, 128>}, {pipeline_mode = #tpu.pipeline_mode<synchronous>, transform_indices = @transform_2, window_bounds = array<i64: 1, 128>}, {pipeline_mode = #tpu.pipeline_mode<synchronous>, transform_indices = @transform_3, window_bounds = array<i64: 128, 128>}, {pipeline_mode = #tpu.pipeline_mode<synchronous>, transform_indices = @transform_4, window_bounds = array<i64: 1, 128>}, {pipeline_mode = #tpu.pipeline_mode<synchronous>, transform_indices = @transform_5, window_bounds = array<i64: 128, 128>}, {pipeline_mode = #tpu.pipeline_mode<synchronous>, transform_indices = @transform_6, window_bounds = array<i64: 1, 128>}, {transform_indices = @transform_7, window_bounds = array<i64: 152, 128>}]} {
    %c0 = arith.constant 0 : index
    %c0_0 = arith.constant 0 : index
    %0 = vector.load %arg1[%c0, %c0_0] : memref<152x128xbf16, #tpu.memory_space<vmem>>, vector<152x128xbf16>
    %c0_1 = arith.constant 0 : index
    %c0_2 = arith.constant 0 : index
    %1 = vector.load %arg2[%c0_1, %c0_2] : memref<128x128xbf16, #tpu.memory_space<vmem>>, vector<128x128xbf16>
    %cst = arith.constant dense<0.000000e+00> : vector<152x128xf32>
    %2 = tpu.matmul %0, %1, %cst {dimension_numbers = #tpu.dot_dimension_numbers<[1], [0], [0], [1], [0, 0, 1, 1], [], []>} : vector<152x128xbf16>, vector<128x128xbf16>, vector<152x128xf32> -> vector<152x128xf32>
    %c0_3 = arith.constant 0 : index
    %c0_4 = arith.constant 0 : index
    %3 = vector.load %arg3[%c0_3, %c0_4] : memref<1x128xf32, #tpu.memory_space<vmem>>, vector<1x128xf32>
    %4 = vector.broadcast %3 : vector<1x128xf32> to vector<152x128xf32>
    %5 = arith.addf %2, %4 : vector<152x128xf32>
    %cst_5 = arith.constant 0.000000e+00 : f32
    %6 = vector.broadcast %cst_5 : f32 to vector<152x128xf32>
    %7 = arith.maximumf %5, %6 : vector<152x128xf32>
    %8 = arith.truncf %7 : vector<152x128xf32> to vector<152x128xbf16>
    %c0_6 = arith.constant 0 : index
    %c0_7 = arith.constant 0 : index
    %9 = vector.load %arg4[%c0_6, %c0_7] : memref<128x128xbf16, #tpu.memory_space<vmem>>, vector<128x128xbf16>
    %cst_8 = arith.constant dense<0.000000e+00> : vector<152x128xf32>
    %10 = tpu.matmul %8, %9, %cst_8 {dimension_numbers = #tpu.dot_dimension_numbers<[1], [0], [0], [1], [0, 0, 1, 1], [], []>} : vector<152x128xbf16>, vector<128x128xbf16>, vector<152x128xf32> -> vector<152x128xf32>
    %c0_9 = arith.constant 0 : index
    %c0_10 = arith.constant 0 : index
    %11 = vector.load %arg5[%c0_9, %c0_10] : memref<1x128xf32, #tpu.memory_space<vmem>>, vector<1x128xf32>
    %12 = vector.broadcast %11 : vector<1x128xf32> to vector<152x128xf32>
    %13 = arith.addf %10, %12 : vector<152x128xf32>
    %cst_11 = arith.constant 0.000000e+00 : f32
    %14 = vector.broadcast %cst_11 : f32 to vector<152x128xf32>
    %15 = arith.maximumf %13, %14 : vector<152x128xf32>
    %16 = arith.truncf %15 : vector<152x128xf32> to vector<152x128xbf16>
    %c0_12 = arith.constant 0 : index
    %c0_13 = arith.constant 0 : index
    %17 = vector.load %arg6[%c0_12, %c0_13] : memref<128x128xbf16, #tpu.memory_space<vmem>>, vector<128x128xbf16>
    %cst_14 = arith.constant dense<0.000000e+00> : vector<152x128xf32>
    %18 = tpu.matmul %16, %17, %cst_14 {dimension_numbers = #tpu.dot_dimension_numbers<[1], [0], [0], [1], [0, 0, 1, 1], [], []>} : vector<152x128xbf16>, vector<128x128xbf16>, vector<152x128xf32> -> vector<152x128xf32>
    %c0_15 = arith.constant 0 : index
    %c0_16 = arith.constant 0 : index
    %19 = vector.load %arg7[%c0_15, %c0_16] : memref<1x128xf32, #tpu.memory_space<vmem>>, vector<1x128xf32>
    %20 = vector.broadcast %19 : vector<1x128xf32> to vector<152x128xf32>
    %21 = arith.addf %18, %20 : vector<152x128xf32>
    %c0_17 = arith.constant 0 : index
    %c0_18 = arith.constant 0 : index
    %22 = vector.load %arg8[%c0_17, %c0_18] : memref<152x128xf32, #tpu.memory_space<vmem>>, vector<152x128xf32>
    tpu.vector_store %arg8[%c0_17, %c0_18], %21 {strides = array<i32>} : memref<152x128xf32, #tpu.memory_space<vmem>>, vector<152x128xf32>,
    return
  }
  func.func @transform_0(%arg0: i32) -> (i32, i32) {
    %c0_i32 = arith.constant 0 : i32
    %c0_i32_0 = arith.constant 0 : i32
    return %arg0, %c0_i32 : i32, i32
  }
  func.func @transform_1(%arg0: i32) -> (i32, i32) {
    %c0_i32 = arith.constant 0 : i32
    %c0_i32_0 = arith.constant 0 : i32
    %c0_i32_1 = arith.constant 0 : i32
    return %c0_i32, %c0_i32_0 : i32, i32
  }
  func.func @transform_2(%arg0: i32) -> (i32, i32) {
    %c0_i32 = arith.constant 0 : i32
    %c0_i32_0 = arith.constant 0 : i32
    %c0_i32_1 = arith.constant 0 : i32
    return %c0_i32, %c0_i32_0 : i32, i32
  }
  func.func @transform_3(%arg0: i32) -> (i32, i32) {
    %c0_i32 = arith.constant 0 : i32
    %c0_i32_0 = arith.constant 0 : i32
    %c0_i32_1 = arith.constant 0 : i32
    return %c0_i32, %c0_i32_0 : i32, i32
  }
  func.func @transform_4(%arg0: i32) -> (i32, i32) {
    %c0_i32 = arith.constant 0 : i32
    %c0_i32_0 = arith.constant 0 : i32
    %c0_i32_1 = arith.constant 0 : i32
    return %c0_i32, %c0_i32_0 : i32, i32
  }
  func.func @transform_5(%arg0: i32) -> (i32, i32) {
    %c0_i32 = arith.constant 0 : i32
    %c0_i32_0 = arith.constant 0 : i32
    %c0_i32_1 = arith.constant 0 : i32
    return %c0_i32, %c0_i32_0 : i32, i32
  }
  func.func @transform_6(%arg0: i32) -> (i32, i32) {
    %c0_i32 = arith.constant 0 : i32
    %c0_i32_0 = arith.constant 0 : i32
    %c0_i32_1 = arith.constant 0 : i32
    return %c0_i32, %c0_i32_0 : i32, i32
  }
  func.func @transform_7(%arg0: i32) -> (i32, i32) {
    %c0_i32 = arith.constant 0 : i32
    %c0_i32_0 = arith.constant 0 : i32
    return %arg0, %c0_i32 : i32, i32
  }
}

</mosaic_0001>

<bundles_post_ra>
// kernel: tpu_custom_call.1
= control target key start
LH: loop header
LB: loop body
LE: loop exit
PB: predicated region body
PF: predicated region fallthrough
CT: control target
= control target key end

     0   :  { %s1813_s0 = inlined_call_operand.hbm [shape: bf16[304,128], index: 0, kind: input, shape index: {}]   ;;  %s1814_s1 = inlined_call_operand.hbm [shape: bf16[128,128], index: 1, kind: input, shape index: {}]   ;;  %s1815_s2 = inlined_call_operand.vmem [shape: f32[1,128], index: 2, kind: input, shape index: {}]   ;;  %s1816_s3 = inlined_call_operand.hbm [shape: bf16[128,128], index: 3, kind: input, shape index: {}]   ;;  %s1817_s4 = inlined_call_operand.vmem [shape: f32[1,128], index: 4, kind: input, shape index: {}]   ;;  %s1818_s5 = inlined_call_operand.hbm [shape: bf16[128,128], index: 5, kind: input, shape index: {}]   ;;  %s1819_s6 = inlined_call_operand.vmem [shape: f32[1,128], index: 6, kind: input, shape index: {}]   ;;  %s1820_s7 = inlined_call_operand.hbm [shape: f32[304,128], index: 7, kind: output, shape index: {}]  }
   0x1   :  { %1823 = sst [smem:[#allocation15_spill]] %s1814_s1 }
   0x2   :  { %1824 = sst [smem:[#allocation16_spill]] %s1816_s3 }
   0x3   :  { %1825 = sst [smem:[#allocation17_spill]] %s1818_s5 }
   0x4   :  { %12 = vsyncpa [#allocation3], 0 }
   0x5   :  { %14 = vsyncpa [#allocation3 + $0x1], 0 }
   0x6   :  { %15 = vsyncpa [#allocation6], 0 }
   0x7   :  { %16 = vsyncpa [#allocation9], 0 }
   0x8   :  { %17 = vsyncpa [#allocation4], 0 }
   0x9   :  { %19 = vsyncpa [#allocation4 + $0x1], 0  ;;  %s1536_s24 = smov 0   ;;  %s1538_s25 = smov 0  }
   0xa   :  { %s1540_s26 = smov 0   ;;  %s1542_s27 = smov 0  }
   0xb LB: > { %s1557_s28 = sadd.s32 4294967295, %s1487_s27   ;;  %s1001_s29 = sadd.s32 4294967294, %s1487_s27   ;;  %s1487_s27 = sphi %s1542_s27, %s1841_s27   ;;  %s1483_s26 = sphi %s1540_s26, %s1840_s26   ;;  %s1479_s25 = sphi %s1538_s25, %s1839_s25   ;;  %s1475_s24 = sphi %s1536_s24, %s1838_s24  }
   0xc   : > { %p45_p0 = scmp.ne.s32.totalorder %s1479_s25, %s1475_s24  ;;  %p46_p1 = scmp.eq.s32.totalorder %s1557_s28, 0 }
   0xd   : > { %p195_p2 = scmp.eq.s32.totalorder %s1557_s28, 1  ;;  %p201_p3 = scmp.eq.s32.totalorder %s1001_s29, 1 }
   0xe   : > { %p1566_p4 = por %p46_p1, %p45_p0  ;;  %p1002_p5 = scmp.ge.s32.totalorder %s1487_s27, 1 }
   0xf   : > { %p1571_p6 = por %p201_p3, %p45_p0  ;;  %p208_p7 = scmp.lt.s32.totalorder %s1487_s27, 3 }
  0x10   : > { %s1828_s1 = sld [smem:[#allocation15_spill]]  ;;  %s1489_s13 = smov [#allocation5]  }
  0x11   : > { %p1579_p8 = pnand %p1002_p5, %p208_p7  ;;  %s221_s14 = sshll.u32 %s1489_s13, 4  ;;  %s222_s14 = int_to_ptr.vmem [resolvable:$true] %s221_s14 }
  0x12   : > { %s1831_s3 = sld [smem:[#allocation16_spill]]  ;;  %s1821_s19 = smov 64  }
  0x13   : > { %p1225_p9 = pneg %p1579_p8  ;;  %s1822_s20 = smov 4  }
  0x14   : > { %s1492_s21 = smov [#allocation7]   ;;  %s1832_s5 = sld [smem:[#allocation17_spill]] }
  0x15   : > { %p1587_p10 = pnand %p1225_p9, %p46_p1  ;;  %s238_s22 = sshll.u32 %s1492_s21, 4  ;;  %s239_s22 = int_to_ptr.vmem [resolvable:$true] %s238_s22 }
  0x16   : > { %s219_s11 = sshll.u32 %s1828_s1, 4  ;;  %s1493_s10 = smov [#allocation8]   ;;  %s220_s11 = int_to_ptr.hbm [resolvable:$true] %s219_s11 }
  0x17   : > { %1228 = dma.hbm_to_vmem [thread:$0]  (!%p1587_p10), %s220_s11, 1024, %s222_s14, [#allocation6], %s1821_s19, %s1821_s19, %s1822_s20  }
  0x18   : > { %s236_s18 = sshll.u32 %s1831_s3, 4  ;;  %s255_s11 = sshll.u32 %s1493_s10, 4  ;;  %s237_s18 = int_to_ptr.hbm [resolvable:$true] %s236_s18  ;;  %s256_s11 = int_to_ptr.vmem [resolvable:$true] %s255_s11 }
  0x19   : > { %1231 = dma.hbm_to_vmem [thread:$0]  (!%p1587_p10), %s237_s18, 1024, %s239_s22, [#allocation6], %s1821_s19, %s1821_s19, %s1822_s20  }
  0x1a   : > { %s253_s9 = sshll.u32 %s1832_s5, 4  ;;  %s1609_s13 = sadd.s32 1, %s1487_s27   ;;  %s254_s9 = int_to_ptr.hbm [resolvable:$true] %s253_s9 }
  0x1b   : > { %1234 = dma.hbm_to_vmem [thread:$0]  (!%p1587_p10), %s254_s9, 1024, %s256_s11, [#allocation9], %s1821_s19, %s1821_s19, %s1822_s20  }
  0x1c   : > { %s29_s14 = ssub.s32 %s1487_s27, %s1609_s13  ;;  %s32_s16 = sadd.s32 1, %s1483_s26 }
  0x1d   : > { %p30_p12 = scmp.eq.s32.totalorder %s29_s14, 0  ;;  %p39_p13 = scmp.ne.s32.totalorder %s1483_s26, %s1479_s25 }
  0x1e   : > { %p40_p0 = scmp.eq.s32.totalorder %s1487_s27, 0  ;;  %p1246_p3 = scmp.lt.s32.totalorder %s1487_s27, 2 }
  0x1f   : > { %s1624_s17 = scalar_select %p30_p12, %s1483_s26, %s32_s16  }
  0x20   : > { %p41_p5 = por %p40_p0, %p39_p13  ;;  %p1628_p7 = por %p195_p2, %p39_p13 }
  0x21   : > { %s272_s15 = sand.u32 1, %s1483_s26   ;;  %s1147_s21 = smul.u32 76, %s1487_s27 }
  0x22   : > { %s1206_s22 = smul.u32 76, %s272_s15  ;;  %p1637_p9 = pnand %p1246_p3, %p41_p5 }
  0x23   : > { %s281_s9 = scalar_lea.hbm %s1813_s0, %s1147_s21  ;;  %s273_s19 = scalar_lea.sflag [#allocation3], %s272_s15 }
  0x24   : > { %s282_s11 = sshll.u32 %s281_s9, 4  ;;  %s276_s14 = scalar_lea.vmem [#allocation2], %s1206_s22  ;;  %s283_s11 = int_to_ptr.hbm [resolvable:$true] %s282_s11 }
  0x25   : > { %s284_s16 = sshll.u32 %s276_s14, 4  ;;  %s1383_s20 = sshra.s32 %s283_s11, 4  ;;  %s285_s16 = int_to_ptr.vmem [resolvable:$true] %s284_s16  ;;  %s1384_s20 = int_to_ptr.hbm [resolvable:$true] %s1383_s20 }
  0x26   : > { %s1385_s1 = scalar_lea.hbm %s1384_s20, 76  ;;  %p1387_p10 = pneg %p1637_p9 }
  0x27   : > { %p1386_p2 = scmp.ne.s32.totalorder %s1384_s20, %s1385_s1  ;;  %s1390_s29 = scalar_lea.hbm %s1813_s0, 152 }
  0x28   : > { %p1391_p0 = scmp.lt.s32.totalorder %s1384_s20, %s1813_s0  ;;  %p1392_p3 = scmp.lt.s32.totalorder %s1390_s29, %s1385_s1 }
  0x29   : > { %p1388_p12 = pnand %p1387_p10, %p1386_p2 }
  0x2a   : > { %p1393_p5 = por %p1392_p3, %p1391_p0 }
  0x2b   : > { %p1389_p13 = pneg %p1388_p12 }
  0x2d   : > { %p1394_p11 = pnand %p1393_p5, %p1389_p13 }
  0x2f   : > { %1397 = shalt.err (!%p1394_p11)
}
  0x30   : > { %s1835_s15 = smov 4   ;;  %s1836_s22 = smov 64  }
  0x31   : > { %1238 = dma.hbm_to_vmem [thread:$0]  (!%p1637_p9), %s283_s11, 1216, %s285_s16, %s273_s19, %s1836_s22, %s1836_s22, %s1835_s15  }
  0x32   : > { %296 = sbr.rel (%p1579_p8) target bundleno = 630 (0x276), region = 48  ;;  %s1657_s9 = sand.u32 (!%p1579_p8), 1, %s1479_s25  }
  0x33   : > { %s1207_s3 = smul.u32 (!%p1579_p8), 76, %s1657_s9  ;;  %s299_s1 = scalar_lea.sflag (!%p1579_p8), [#allocation3], %s1657_s9 }
  0x35   : > { %s1661_s5 = scalar_lea.vmem (!%p1579_p8), [#allocation2], %s1207_s3 }
  0x37   : > { %1458 = dma.done.wait (%p1566_p4), %s299_s1, 1216  }
  0x38   : > { %1460 = vsyncadd (%p1566_p4), %s299_s1, 4294966080 }
  0x39   : > { %1462 = dma.done.wait (%p46_p1), [#allocation6], 2048  }
  0x3a   : > { %1464 = vsyncadd (%p46_p1), [#allocation6], 4294965248 }
  0x3b   : > { %1466 = dma.done.wait (%p46_p1), [#allocation9], 1024  }
  0x3c   : > { %1468 = vsyncadd (%p46_p1), [#allocation9], 4294966272  ;;  %v1164_v0 = vld [vmem:[#allocation5 + $0x38] sm:$0xff]  ;;  %v1163_v1 = vld [vmem:[#allocation5 + $0x30] sm:$0xff]  ;;  %s1208_s10 = smul.u32 152, %s1657_s9  ;;  %s884_s1 = scalar_lea.sflag [#allocation4], %s1657_s9 }
  0x3d   : > { %496 = vmatpush.bf16.msra.mxu0 %v1164_v0  ;;  %1182 = vmatpush.bf16.msra.mxu3 %v1164_v0  ;;  %v1162_v2 = vld [vmem:[#allocation5 + $0x28] sm:$0xff]  ;;  %v1161_v3 = vld [vmem:[#allocation5 + $0x20] sm:$0xff]  ;;  %v1160_v4 = vld [vmem:[#allocation5 + $0x18] sm:$0xff]  ;;  %s1181_s21 = smul.u32 152, %s1557_s28  ;;  %s1433_s19 = scalar_lea.hbm %s1820_s7, 304 }
  0x3e   : > { %v1159_v5 = vld [vmem:[#allocation5 + $0x10] sm:$0xff]  ;;  %v1158_v6 = vld [vmem:[#allocation5 + $0x8] sm:$0xff]  ;;  %v1157_v7 = vld [vmem:[#allocation5] sm:$0xff]  ;;  %s1740_s16 = scalar_lea.vmem [#allocation10], %s1208_s10 }
  0x3f   : > { %v1148_v8 = vld [vmem:[%s1661_s5] sm:$0xff]  ;;  %v1149_v9 = vld [vmem:[%s1661_s5 + $0x8] sm:$0xff]  ;;  %v1150_v10 = vld [vmem:[%s1661_s5 + $0x10] sm:$0xff]  ;;  %s895_s15 = scalar_lea.hbm %s1820_s7, %s1181_s21  ;;  %s896_s22 = sshll.u32 %s1740_s16, 4  ;;  %s897_s22 = int_to_ptr.vmem [resolvable:$true] %s896_s22 }
  0x40   : > { %v1156_v11 = vld [vmem:[%s1661_s5 + $0x40] sm:$0xff]  ;;  %v1151_v12 = vld [vmem:[%s1661_s5 + $0x18] sm:$0xff]  ;;  %v369_v15 = vld [vmem:[%s1661_s5 + $0x48] sm:$0xf]  ;;  %s898_s3 = sshll.u32 %s895_s15, 4  ;;  %s899_s3 = int_to_ptr.hbm [resolvable:$true] %s898_s3 }
  0x41   : > { %497 = vmatpush.bf16.msra.mxu0 %v1163_v1  ;;  %1183 = vmatpush.bf16.msra.mxu3 %v1163_v1  ;;  %v1152_v13 = vld [vmem:[%s1661_s5 + $0x20] sm:$0xff]  ;;  %v1153_v16 = vld [vmem:[%s1661_s5 + $0x28] sm:$0xff]  ;;  %v427_v17 = vunpack.c.l.b16 %v369_v15  ;;  %v1154_v23 = vld [vmem:[%s1661_s5 + $0x30] sm:$0xff] }
  0x42   : > { %v1172_v14 = vld [vmem:[#allocation7 + $0x38] sm:$0xff]  ;;  %v1171_v19 = vld [vmem:[#allocation7 + $0x30] sm:$0xff]  ;;  %v1170_v20 = vld [vmem:[#allocation7 + $0x28] sm:$0xff] }
  0x43   : > { %651 = vmatpush.bf16.msra.mxu1 %v1172_v14  ;;  %v437_v18 = vpack.c.b16 %v427_v17, %v427_v17  ;;  %v1169_v21 = vld [vmem:[#allocation7 + $0x20] sm:$0xff]  ;;  %v1168_v22 = vld [vmem:[#allocation7 + $0x18] sm:$0xff]  ;;  %v1167_v24 = vld [vmem:[#allocation7 + $0x10] sm:$0xff] }
  0x44   : > { %v1166_v25 = vld [vmem:[#allocation7 + $0x8] sm:$0xff]  ;;  %v1165_v26 = vld [vmem:[#allocation7] sm:$0xff] }
  0x45   : > { %498 = vmatpush.bf16.msra.mxu0 %v1162_v2  ;;  %1184 = vmatpush.bf16.msra.mxu3 %v1162_v2  ;;  %v1155_v27 = vld [vmem:[%s1661_s5 + $0x38] sm:$0xff]  ;;  %v1688_v29 = vld [vmem:[%s1815_s2] ss:$0 sm:$0xff]  ;;  %s1427_s5 = sshra.s32 %s899_s3, 4  ;;  %s1428_s5 = int_to_ptr.hbm [resolvable:$true] %s1427_s5 }
  0x46   : > { %s1429_s28 = scalar_lea.hbm %s1428_s5, 152  ;;  %p1434_p11 = scmp.lt.s32.totalorder %s1428_s5, %s1820_s7 }
  0x47   : > { %652 = vmatpush.bf16.msra.mxu1 %v1171_v19  ;;  %p1430_p1 = scmp.ne.s32.totalorder %s1428_s5, %s1429_s28  ;;  %p1435_p9 = scmp.lt.s32.totalorder %s1433_s19, %s1429_s28 }
  0x49   : > { %499 = vmatpush.bf16.msra.mxu0 %v1161_v3  ;;  %1185 = vmatpush.bf16.msra.mxu3 %v1161_v3  ;;  %p1431_p4 = pnand %p1430_p1, %p1628_p7  ;;  %p1436_p2 = por %p1435_p9, %p1434_p11 }
  0x4b   : > { %653 = vmatpush.bf16.msra.mxu1 %v1170_v20  ;;  %p1432_p8 = pneg %p1431_p4 }
  0x4d   : > { %500 = vmatpush.bf16.msra.mxu0 %v1160_v4  ;;  %1186 = vmatpush.bf16.msra.mxu3 %v1160_v4  ;;  %p1437_p10 = pnand %p1436_p2, %p1432_p8 }
  0x4f   : > { %654 = vmatpush.bf16.msra.mxu1 %v1169_v21 }
  0x51   : > { %501 = vmatpush.bf16.msra.mxu0 %v1159_v5  ;;  %1187 = vmatpush.bf16.msra.mxu3 %v1159_v5 }
  0x53   : > { %655 = vmatpush.bf16.msra.mxu1 %v1168_v22 }
  0x55   : > { %502 = vmatpush.bf16.msra.mxu0 %v1158_v6  ;;  %1188 = vmatpush.bf16.msra.mxu3 %v1158_v6 }
  0x57   : > { %656 = vmatpush.bf16.msra.mxu1 %v1167_v24 }
  0x59   : > { %503 = vmatpush.bf16.msra.mxu0 %v1157_v7  ;;  %1189 = vmatpush.bf16.msra.mxu3 %v1157_v7 }
  0x5b   : > { %657 = vmatpush.bf16.msra.mxu1 %v1166_v25 }
  0x5c   : > { %504 = vmatmul.bf16.vlgmr.msra.gmra.mxu0 %v1148_v8  ;;  %544 = vmatmul.bf16.vlgmr.msra.gmra.mxu3 %v1156_v11 }
  0x5d   : > { %1190 = vmatpush.bf16.msrb.mxu3 %v1172_v14  ;;  %v1180_v14 = vld [vmem:[#allocation8 + $0x38] sm:$0xff] }
  0x5e   : > { %806 = vmatpush.bf16.msra.mxu2 %v1180_v14 }
  0x5f   : > { %658 = vmatpush.bf16.msra.mxu1 %v1165_v26 }
  0x61   : > { %1191 = vmatpush.bf16.msrb.mxu3 %v1171_v19 }
  0x65   : > { %1192 = vmatpush.bf16.msrb.mxu3 %v1170_v20  ;;  %v1179_v20 = vld [vmem:[#allocation8 + $0x30] sm:$0xff] }
  0x66   : > { %807 = vmatpush.bf16.msra.mxu2 %v1179_v20 }
  0x69   : > { %1193 = vmatpush.bf16.msrb.mxu3 %v1169_v21 }
  0x6c   : > { %509 = vmatmul.bf16.gmra.mxu0 %v1149_v9  ;;  %549 = vmatmul.bf16.gmra.mxu3 %v437_v18 }
  0x6d   : > { %1194 = vmatpush.bf16.msrb.mxu3 %v1168_v22  ;;  %v1178_v22 = vld [vmem:[#allocation8 + $0x28] sm:$0xff] }
  0x6e   : > { %808 = vmatpush.bf16.msra.mxu2 %v1178_v22 }
  0x71   : > { %1195 = vmatpush.bf16.msrb.mxu3 %v1167_v24 }
  0x75   : > { %1196 = vmatpush.bf16.msrb.mxu3 %v1166_v25 }
  0x79   : > { %1197 = vmatpush.bf16.msrb.mxu3 %v1165_v26 }
  0x7c   : > { %514 = vmatmul.bf16.gmra.mxu0 %v1150_v10 }
  0x7d   : > { %1198 = vmatpush.bf16.msra.mxu3 %v1180_v14 }
  0x81   : > { %1199 = vmatpush.bf16.msra.mxu3 %v1179_v20 }
  0x85   : > { %1200 = vmatpush.bf16.msra.mxu3 %v1178_v22 }
  0x8c   : > { %519 = vmatmul.bf16.gmra.mxu0 %v1151_v12 }
  0x9c   : > { %524 = vmatmul.bf16.gmra.mxu0 %v1152_v13 }
  0xac   : > { %529 = vmatmul.bf16.gmra.mxu0 %v1153_v16 }
  0xbc   : > { %534 = vmatmul.bf16.gmra.mxu0 %v1154_v23  ;;  %v1177_v23 = vld [vmem:[#allocation8 + $0x20] sm:$0xff] }
  0xbd   : > { %809 = vmatpush.bf16.msra.mxu2 %v1177_v23  ;;  %1201 = vmatpush.bf16.msra.mxu3 %v1177_v23 }
  0xcc   : > { %539 = vmatmul.bf16.gmra.mxu0 %v1155_v27  ;;  %v1176_v27 = vld [vmem:[#allocation8 + $0x18] sm:$0xff] }
  0xcd   : > { %810 = vmatpush.bf16.msra.mxu2 %v1176_v27  ;;  %1202 = vmatpush.bf16.msra.mxu3 %v1176_v27 }
  0xd9   : > { %v505_v28 = vpop.f32.mrf.mxu0 }
  0xda   : > { %v506_v30 = vadd.f32 %v1688_v29, %v505_v28 }
  0xdc   : > { %v554_v33 = vmax.f32 %v506_v30, 0.0 }
  0xdf   : > { %v545_v44 = vpop.f32.mrf.mxu3 }
  0xe0   : > { %v546_v50 = vadd.f32 %v1688_v29, %v545_v44 }
  0xe1   : > { %v507_v31 = vpop.f32.mrf.mxu0 }
  0xe2   : > { %v508_v32 = vadd.f32 %v1688_v29, %v507_v31  ;;  %v570_v53 = vmax.f32 %v546_v50, 0.0 }
  0xe4   : > { %v555_v34 = vmax.f32 %v508_v32, 0.0  ;;  %v1175_v32 = vld [vmem:[#allocation8 + $0x10] sm:$0xff] }
  0xe5   : > { %811 = vmatpush.bf16.msra.mxu2 %v1175_v32  ;;  %1203 = vmatpush.bf16.msra.mxu3 %v1175_v32 }
  0xe6   : > { %v573_v35 = vpack.c.bf16 %v555_v34, %v554_v33  ;;  %v1174_v34 = vld [vmem:[#allocation8 + $0x8] sm:$0xff] }
  0xe7   : > { %v547_v52 = vpop.f32.mrf.mxu3 }
  0xe8   : > { %659 = vmatmul.bf16.vlgmr.msra.gmra.mxu1 %v573_v35  ;;  %v548_v54 = vadd.f32 %v1688_v29, %v547_v52  ;;  %v1173_v35 = vld [vmem:[#allocation8] sm:$0xff] }
  0xe9   : > { %v510_v36 = vpop.f32.mrf.mxu0  ;;  %812 = vmatpush.bf16.msra.mxu2 %v1174_v34  ;;  %1204 = vmatpush.bf16.msra.mxu3 %v1174_v34 }
  0xea   : > { %v511_v37 = vadd.f32 %v1688_v29, %v510_v36  ;;  %v571_v56 = vmax.f32 %v548_v54, 0.0 }
  0xec   : > { %v556_v40 = vmax.f32 %v511_v37, 0.0  ;;  %v581_v57 = vpack.c.bf16 %v571_v56, %v570_v53 }
  0xed   : > { %813 = vmatpush.bf16.msra.mxu2 %v1173_v35  ;;  %1205 = vmatpush.bf16.msra.mxu3 %v1173_v35 }
  0xee   : > { %699 = vmatmul.bf16.vlgmr.msrb.gmra.mxu3 %v581_v57 }
  0xef   : > { %v550_v8 = vpop.f32.mrf.mxu3 }
  0xf0   : > { %v551_v10 = vadd.f32 %v1688_v29, %v550_v8 }
  0xf1   : > { %v512_v38 = vpop.f32.mrf.mxu0 }
  0xf2   : > { %v513_v39 = vadd.f32 %v1688_v29, %v512_v38  ;;  %v572_v13 = vmax.f32 %v551_v10, 0.0 }
  0xf4   : > { %v557_v41 = vmax.f32 %v513_v39, 0.0  ;;  %v582_v17 = vpack.c.bf16 %v572_v13, %v572_v13 }
  0xf6   : > { %v574_v42 = vpack.c.bf16 %v557_v41, %v556_v40 }
  0xf7   : > { %v552_v19 = vpop.f32.mrf.mxu3 }
  0xf8   : > { %664 = vmatmul.bf16.gmra.mxu1 %v574_v42 }
  0xf9   : > { %v515_v43 = vpop.f32.mrf.mxu0 }
  0xfa   : > { %v516_v45 = vadd.f32 %v1688_v29, %v515_v43  ;;  %v1712_v43 = vld [vmem:[%s1817_s4] ss:$0 sm:$0xff] }
  0xfc   : > { %v558_v48 = vmax.f32 %v516_v45, 0.0 }
  0xfe   : > { %704 = vmatmul.bf16.gmra.mxu3 %v582_v17 }
 0x101   : > { %v517_v46 = vpop.f32.mrf.mxu0 }
 0x102   : > { %v518_v47 = vadd.f32 %v1688_v29, %v517_v46 }
 0x104   : > { %v559_v49 = vmax.f32 %v518_v47, 0.0 }
 0x106   : > { %v575_v51 = vpack.c.bf16 %v559_v49, %v558_v48 }
 0x108   : > { %669 = vmatmul.bf16.gmra.mxu1 %v575_v51 }
 0x109   : > { %v520_v55 = vpop.f32.mrf.mxu0 }
 0x10a   : > { %v521_v58 = vadd.f32 %v1688_v29, %v520_v55 }
 0x10c   : > { %v560_v61 = vmax.f32 %v521_v58, 0.0 }
 0x111   : > { %v522_v59 = vpop.f32.mrf.mxu0 }
 0x112   : > { %v523_v60 = vadd.f32 %v1688_v29, %v522_v59 }
 0x114   : > { %v561_v62 = vmax.f32 %v523_v60, 0.0 }
 0x116   : > { %v576_v63 = vpack.c.bf16 %v561_v62, %v560_v61 }
 0x118   : > { %674 = vmatmul.bf16.gmra.mxu1 %v576_v63 }
 0x119   : > { %v525_v0 = vpop.f32.mrf.mxu0 }
 0x11a   : > { %v526_v1 = vadd.f32 %v1688_v29, %v525_v0 }
 0x11c   : > { %v562_v4 = vmax.f32 %v526_v1, 0.0 }
 0x121   : > { %v527_v2 = vpop.f32.mrf.mxu0 }
 0x122   : > { %v528_v3 = vadd.f32 %v1688_v29, %v527_v2 }
 0x124   : > { %v563_v5 = vmax.f32 %v528_v3, 0.0 }
 0x126   : > { %v577_v6 = vpack.c.bf16 %v563_v5, %v562_v4 }
 0x128   : > { %679 = vmatmul.bf16.gmra.mxu1 %v577_v6 }
 0x129   : > { %v530_v7 = vpop.f32.mrf.mxu0 }
 0x12a   : > { %v531_v9 = vadd.f32 %v1688_v29, %v530_v7 }
 0x12c   : > { %v564_v15 = vmax.f32 %v531_v9, 0.0 }
 0x131   : > { %v532_v11 = vpop.f32.mrf.mxu0 }
 0x132   : > { %v533_v12 = vadd.f32 %v1688_v29, %v532_v11 }
 0x134   : > { %v565_v16 = vmax.f32 %v533_v12, 0.0 }
 0x136   : > { %v578_v18 = vpack.c.bf16 %v565_v16, %v564_v15 }
 0x138   : > { %684 = vmatmul.bf16.gmra.mxu1 %v578_v18 }
 0x139   : > { %v535_v21 = vpop.f32.mrf.mxu0 }
 0x13a   : > { %v536_v24 = vadd.f32 %v1688_v29, %v535_v21 }
 0x13c   : > { %v566_v28 = vmax.f32 %v536_v24, 0.0 }
 0x141   : > { %v537_v25 = vpop.f32.mrf.mxu0 }
 0x142   : > { %v538_v26 = vadd.f32 %v1688_v29, %v537_v25 }
 0x144   : > { %v567_v30 = vmax.f32 %v538_v26, 0.0 }
 0x146   : > { %v579_v31 = vpack.c.bf16 %v567_v30, %v566_v28 }
 0x148   : > { %689 = vmatmul.bf16.gmra.mxu1 %v579_v31 }
 0x149   : > { %v540_v33 = vpop.f32.mrf.mxu0 }
 0x14a   : > { %v541_v36 = vadd.f32 %v1688_v29, %v540_v33 }
 0x14c   : > { %v568_v39 = vmax.f32 %v541_v36, 0.0 }
 0x151   : > { %v542_v37 = vpop.f32.mrf.mxu0 }
 0x152   : > { %v543_v38 = vadd.f32 %v1688_v29, %v542_v37 }
 0x154   : > { %v569_v40 = vmax.f32 %v543_v38, 0.0 }
 0x156   : > { %v580_v41 = vpack.c.bf16 %v569_v40, %v568_v39 }
 0x158   : > { %694 = vmatmul.bf16.gmra.mxu1 %v580_v41 }
 0x165   : > { %v660_v42 = vpop.f32.mrf.mxu1 }
 0x166   : > { %v661_v44 = vadd.f32 %v1712_v43, %v660_v42 }
 0x168   : > { %v709_v47 = vmax.f32 %v661_v44, 0.0 }
 0x16d   : > { %v662_v45 = vpop.f32.mrf.mxu1 }
 0x16e   : > { %v663_v46 = vadd.f32 %v1712_v43, %v662_v45 }
 0x170   : > { %v710_v48 = vmax.f32 %v663_v46, 0.0 }
 0x171   : > { %v700_v62 = vpop.f32.mrf.mxu3 }
 0x172   : > { %v728_v49 = vpack.c.bf16 %v710_v48, %v709_v47  ;;  %v701_v1 = vadd.f32 %v1712_v43, %v700_v62  ;;  %v1737_v48 = vld [vmem:[%s1819_s6] ss:$0 sm:$0xff] }
 0x174   : > { %814 = vmatmul.bf16.vlgmr.msra.gmra.mxu2 %v728_v49  ;;  %v725_v3 = vmax.f32 %v701_v1, 0.0 }
 0x175   : > { %v665_v29 = vpop.f32.mrf.mxu1 }
 0x176   : > { %v666_v50 = vadd.f32 %v1712_v43, %v665_v29 }
 0x178   : > { %v711_v53 = vmax.f32 %v666_v50, 0.0 }
 0x179   : > { %v702_v2 = vpop.f32.mrf.mxu3 }
 0x17a   : > { %v703_v4 = vadd.f32 %v1712_v43, %v702_v2 }
 0x17c   : > { %v726_v6 = vmax.f32 %v703_v4, 0.0 }
 0x17d   : > { %v667_v51 = vpop.f32.mrf.mxu1 }
 0x17e   : > { %v668_v52 = vadd.f32 %v1712_v43, %v667_v51  ;;  %v736_v9 = vpack.c.bf16 %v726_v6, %v725_v3 }
 0x180   : > { %v712_v54 = vmax.f32 %v668_v52, 0.0  ;;  %854 = vmatmul.bf16.vlgmr.msra.gmra.mxu3 %v736_v9 }
 0x181   : > { %v705_v21 = vpop.f32.mrf.mxu3 }
 0x182   : > { %v729_v55 = vpack.c.bf16 %v712_v54, %v711_v53  ;;  %v706_v22 = vadd.f32 %v1712_v43, %v705_v21 }
 0x184   : > { %819 = vmatmul.bf16.gmra.mxu2 %v729_v55  ;;  %v727_v24 = vmax.f32 %v706_v22, 0.0 }
 0x185   : > { %v670_v56 = vpop.f32.mrf.mxu1 }
 0x186   : > { %v671_v57 = vadd.f32 %v1712_v43, %v670_v56  ;;  %v737_v27 = vpack.c.bf16 %v727_v24, %v727_v24 }
 0x188   : > { %v713_v60 = vmax.f32 %v671_v57, 0.0 }
 0x189   : > { %v707_v31 = vpop.f32.mrf.mxu3 }
 0x18d   : > { %v672_v58 = vpop.f32.mrf.mxu1 }
 0x18e   : > { %v673_v59 = vadd.f32 %v1712_v43, %v672_v58 }
 0x190   : > { %v714_v61 = vmax.f32 %v673_v59, 0.0  ;;  %859 = vmatmul.bf16.gmra.mxu3 %v737_v27 }
 0x192   : > { %v730_v63 = vpack.c.bf16 %v714_v61, %v713_v60 }
 0x194   : > { %824 = vmatmul.bf16.gmra.mxu2 %v730_v63 }
 0x195   : > { %v675_v0 = vpop.f32.mrf.mxu1 }
 0x196   : > { %v676_v5 = vadd.f32 %v1712_v43, %v675_v0 }
 0x198   : > { %v715_v10 = vmax.f32 %v676_v5, 0.0 }
 0x19d   : > { %v677_v7 = vpop.f32.mrf.mxu1 }
 0x19e   : > { %v678_v8 = vadd.f32 %v1712_v43, %v677_v7 }
 0x1a0   : > { %v716_v11 = vmax.f32 %v678_v8, 0.0 }
 0x1a2   : > { %v731_v12 = vpack.c.bf16 %v716_v11, %v715_v10 }
 0x1a4   : > { %829 = vmatmul.bf16.gmra.mxu2 %v731_v12 }
 0x1a5   : > { %v680_v13 = vpop.f32.mrf.mxu1 }
 0x1a6   : > { %v681_v14 = vadd.f32 %v1712_v43, %v680_v13 }
 0x1a8   : > { %v717_v17 = vmax.f32 %v681_v14, 0.0 }
 0x1ad   : > { %v682_v15 = vpop.f32.mrf.mxu1 }
 0x1ae   : > { %v683_v16 = vadd.f32 %v1712_v43, %v682_v15 }
 0x1b0   : > { %v718_v18 = vmax.f32 %v683_v16, 0.0 }
 0x1b2   : > { %v732_v19 = vpack.c.bf16 %v718_v18, %v717_v17 }
 0x1b4   : > { %834 = vmatmul.bf16.gmra.mxu2 %v732_v19 }
 0x1b5   : > { %v685_v20 = vpop.f32.mrf.mxu1 }
 0x1b6   : > { %v686_v23 = vadd.f32 %v1712_v43, %v685_v20 }
 0x1b8   : > { %v719_v28 = vmax.f32 %v686_v23, 0.0 }
 0x1bd   : > { %v687_v25 = vpop.f32.mrf.mxu1 }
 0x1be   : > { %v688_v26 = vadd.f32 %v1712_v43, %v687_v25 }
 0x1c0   : > { %v720_v30 = vmax.f32 %v688_v26, 0.0 }
 0x1c2   : > { %v733_v32 = vpack.c.bf16 %v720_v30, %v719_v28 }
 0x1c4   : > { %839 = vmatmul.bf16.gmra.mxu2 %v733_v32 }
 0x1c5   : > { %v690_v33 = vpop.f32.mrf.mxu1 }
 0x1c6   : > { %v691_v34 = vadd.f32 %v1712_v43, %v690_v33 }
 0x1c8   : > { %v721_v37 = vmax.f32 %v691_v34, 0.0 }
 0x1cd   : > { %v692_v35 = vpop.f32.mrf.mxu1 }
 0x1ce   : > { %v693_v36 = vadd.f32 %v1712_v43, %v692_v35 }
 0x1d0   : > { %v722_v38 = vmax.f32 %v693_v36, 0.0 }
 0x1d2   : > { %v734_v39 = vpack.c.bf16 %v722_v38, %v721_v37 }
 0x1d4   : > { %844 = vmatmul.bf16.gmra.mxu2 %v734_v39 }
 0x1d5   : > { %v695_v40 = vpop.f32.mrf.mxu1 }
 0x1d6   : > { %v696_v41 = vadd.f32 %v1712_v43, %v695_v40 }
 0x1d8   : > { %v723_v45 = vmax.f32 %v696_v41, 0.0 }
 0x1dd   : > { %v697_v42 = vpop.f32.mrf.mxu1 }
 0x1de   : > { %v698_v44 = vadd.f32 %v1712_v43, %v697_v42 }
 0x1e0   : > { %v724_v46 = vmax.f32 %v698_v44, 0.0 }
 0x1e2   : > { %v735_v47 = vpack.c.bf16 %v724_v46, %v723_v45 }
 0x1e4   : > { %849 = vmatmul.bf16.gmra.mxu2 %v735_v47 }
 0x1f7   : > { %v815_v49 = vpop.f32.mrf.mxu2 }
 0x1f8   : > { %v816_v29 = vadd.f32 %v1737_v48, %v815_v49 }
 0x1fa   : > { %864 = vst [vmem:[%s1740_s16] sm:$0xff] %v816_v29 }
 0x1ff   : > { %v817_v43 = vpop.f32.mrf.mxu2 }
 0x200   : > { %v818_v50 = vadd.f32 %v1737_v48, %v817_v43 }
 0x202   : > { %865 = vst [vmem:[%s1740_s16 + $0x8] sm:$0xff] %v818_v50 }
 0x203   : > { %v855_v59 = vpop.f32.mrf.mxu3 }
 0x204   : > { %v856_v60 = vadd.f32 %v1737_v48, %v855_v59 }
 0x206   : > { %880 = vst [vmem:[%s1740_s16 + $0x80] sm:$0xff] %v856_v60 }
 0x207   : > { %v820_v51 = vpop.f32.mrf.mxu2 }
 0x208   : > { %v821_v52 = vadd.f32 %v1737_v48, %v820_v51 }
 0x20a   : > { %866 = vst [vmem:[%s1740_s16 + $0x10] sm:$0xff] %v821_v52 }
 0x20b   : > { %v857_v63 = vpop.f32.mrf.mxu3 }
 0x20c   : > { %v858_v0 = vadd.f32 %v1737_v48, %v857_v63 }
 0x20e   : > { %881 = vst [vmem:[%s1740_s16 + $0x88] sm:$0xff] %v858_v0 }
 0x20f   : > { %v822_v53 = vpop.f32.mrf.mxu2 }
 0x210   : > { %v823_v54 = vadd.f32 %v1737_v48, %v822_v53 }
 0x212   : > { %867 = vst [vmem:[%s1740_s16 + $0x18] sm:$0xff] %v823_v54 }
 0x213   : > { %v860_v7 = vpop.f32.mrf.mxu3 }
 0x214   : > { %v861_v8 = vadd.f32 %v1737_v48, %v860_v7 }
 0x216   : > { %882 = vst [vmem:[%s1740_s16 + $0x90] sm:$0xff] %v861_v8 }
 0x217   : > { %v825_v55 = vpop.f32.mrf.mxu2 }
 0x218   : > { %v826_v56 = vadd.f32 %v1737_v48, %v825_v55 }
 0x21a   : > { %868 = vst [vmem:[%s1740_s16 + $0x20] sm:$0xff] %v826_v56 }
 0x21b   : > { %v862_v11 = vpop.f32.mrf.mxu3 }
 0x21f   : > { %v827_v57 = vpop.f32.mrf.mxu2 }
 0x220   : > { %v828_v58 = vadd.f32 %v1737_v48, %v827_v57 }
 0x222   : > { %869 = vst [vmem:[%s1740_s16 + $0x28] sm:$0xff] %v828_v58 }
 0x227   : > { %v830_v61 = vpop.f32.mrf.mxu2 }
 0x228   : > { %v831_v62 = vadd.f32 %v1737_v48, %v830_v61 }
 0x22a   : > { %870 = vst [vmem:[%s1740_s16 + $0x30] sm:$0xff] %v831_v62 }
 0x22f   : > { %v832_v1 = vpop.f32.mrf.mxu2 }
 0x230   : > { %v833_v2 = vadd.f32 %v1737_v48, %v832_v1 }
 0x232   : > { %871 = vst [vmem:[%s1740_s16 + $0x38] sm:$0xff] %v833_v2 }
 0x237   : > { %v835_v3 = vpop.f32.mrf.mxu2 }
 0x238   : > { %v836_v4 = vadd.f32 %v1737_v48, %v835_v3 }
 0x23a   : > { %872 = vst [vmem:[%s1740_s16 + $0x40] sm:$0xff] %v836_v4 }
 0x23f   : > { %v837_v5 = vpop.f32.mrf.mxu2 }
 0x240   : > { %v838_v6 = vadd.f32 %v1737_v48, %v837_v5 }
 0x242   : > { %873 = vst [vmem:[%s1740_s16 + $0x48] sm:$0xff] %v838_v6 }
 0x247   : > { %v840_v9 = vpop.f32.mrf.mxu2 }
 0x248   : > { %v841_v10 = vadd.f32 %v1737_v48, %v840_v9 }
 0x24a   : > { %874 = vst [vmem:[%s1740_s16 + $0x50] sm:$0xff] %v841_v10 }
 0x24f   : > { %v842_v12 = vpop.f32.mrf.mxu2 }
 0x250   : > { %v843_v13 = vadd.f32 %v1737_v48, %v842_v12 }
 0x252   : > { %875 = vst [vmem:[%s1740_s16 + $0x58] sm:$0xff] %v843_v13 }
 0x257   : > { %v845_v14 = vpop.f32.mrf.mxu2 }
 0x258   : > { %v846_v15 = vadd.f32 %v1737_v48, %v845_v14 }
 0x25a   : > { %876 = vst [vmem:[%s1740_s16 + $0x60] sm:$0xff] %v846_v15 }
 0x25f   : > { %v847_v16 = vpop.f32.mrf.mxu2 }
 0x260   : > { %v848_v17 = vadd.f32 %v1737_v48, %v847_v16 }
 0x262   : > { %877 = vst [vmem:[%s1740_s16 + $0x68] sm:$0xff] %v848_v17 }
 0x267   : > { %v850_v18 = vpop.f32.mrf.mxu2 }
 0x268   : > { %v851_v19 = vadd.f32 %v1737_v48, %v850_v18 }
 0x26a   : > { %878 = vst [vmem:[%s1740_s16 + $0x70] sm:$0xff] %v851_v19 }
 0x26f   : > { %v852_v20 = vpop.f32.mrf.mxu2 }
 0x270   : > { %v853_v21 = vadd.f32 %v1737_v48, %v852_v20 }
 0x272   : > { %879 = vst [vmem:[%s1740_s16 + $0x78] sm:$0xff] %v853_v21 }
 0x273   : > { %1440 = shalt.err (!%p1437_p10)
}
 0x274   : > { %s1494_s9 = smov 128   ;;  %s1495_s11 = smov 8  }
 0x275   : > { %1223 = dma.vmem_to_hbm [thread:$0]  (%p1628_p7), %s897_s22, 2432, %s899_s3, %s884_s1, %s1494_s9, %s1494_s9, %s1495_s11  }
 0x276 PF: > { %s913_s14 = sand.u32 1, %s1475_s24   ;;  %p1837_p12 = scmp.ge.s32.totalorder %s1487_s27, 2 }
 0x277   : > { %s914_s16 = scalar_lea.sflag [#allocation4], %s913_s14 }
 0x278   : > { %p1240_p13 = pnand %p1837_p12, %p1571_p6 }
 0x27a   : > { %p1241_p0 = pneg %p1240_p13 }
 0x27c   : > { %1470 = dma.done.wait (%p1241_p0), %s914_s16, 2432  }
 0x27d   : > { %1472 = vsyncadd (%p1241_p0), %s914_s16, 4294964864  ;;  %p22_p3 = scmp.ge.s32.totalorder %s1609_s13, 4   ;;  %s1838_s24 = smov %s1479_s25 }
 0x27e   : > { %s1839_s25 = smov %s1483_s26  ;;  %s1840_s26 = smov %s1624_s17 }
 0x27f   : > { %s1841_s27 = smov %s1609_s13  ;;  %24 = sbr.rel (!%p22_p3) target bundleno = 11 (0xb), region = 105 }
 0x284   :  { %920 = vsyncpa [#allocation3], 1 }
 0x285   :  { %922 = vsyncpa [#allocation3 + $0x1], 1 }
 0x286   :  { %923 = vsyncpa [#allocation6], 1 }
 0x287   :  { %924 = vsyncpa [#allocation9], 1 }
 0x288   :  { %925 = vsyncpa [#allocation4], 1 }
 0x289   :  { %927 = vsyncpa [#allocation4 + $0x1], 1 }

</bundles_post_ra>
